<compile_context>
chip_gen: v7x
topology: tpu7x:2x2x1
jax: 0.10.0
libtpu: 0.0.40
codegen_flags: <defaults>
</compile_context>

<pallas_src>
import functools

import jax
import jax.numpy as jnp
from jax import lax
from jax.experimental import pallas as pl
from jax.experimental.pallas import tpu as pltpu


def clip_loss_kernel(scale_ref, img_ref, txt_ref, loss_ref):
    """One row tile of the symmetric CLIP loss.

    scale_ref: (1, 1) f32 in SMEM        - logit_scale
    img_ref  : (B, D) native dtype, VMEM - full image features (resident)
    txt_ref  : (B, D) native dtype, VMEM - full text features (resident)
    loss_ref : (TQ, 1) f32               - per-row (lse_img + lse_txt - 2*diag)
    """
    i = pl.program_id(0)
    tq = loss_ref.shape[0]

    row0 = i * tq
    if tq % 8 == 0:
        row0 = pl.multiple_of(row0, 8)

    scale = scale_ref[0, 0]  # f32 scalar

    # Row tiles sliced out of the resident feature blocks (no extra DMA).
    img_tile = img_ref[pl.ds(row0, tq), :]  # (TQ, D) native dtype
    txt_tile = txt_ref[pl.ds(row0, tq), :]  # (TQ, D) native dtype

    # Fold logit_scale into the small row-tile operands (O(TQ*D) multiplies,
    # instead of scaling the (TQ, B) logits).
    scale_n = scale.astype(img_tile.dtype)
    img_scaled = img_tile * scale_n
    txt_scaled = txt_tile * scale_n

    # Correct-class logit for row r (identical for both directions):
    # scale * <img_r, txt_r>. Direct O(TQ*D) dot, no B x B diag mask.
    diag = scale * jnp.sum(
        img_tile.astype(jnp.float32) * txt_tile.astype(jnp.float32),
        axis=-1, keepdims=True)                               # (TQ, 1) f32

    # Contract the feature dim of both operands directly (A @ B^T without
    # materializing B^T); native-dtype MXU inputs, f32 accumulation.
    dn = (((1,), (1,)), ((), ()))
    logits_img = lax.dot_general(img_scaled, txt_ref[...], dn,
                                 preferred_element_type=jnp.float32)  # (TQ,B)
    logits_txt = lax.dot_general(txt_scaled, img_ref[...], dn,
                                 preferred_element_type=jnp.float32)  # (TQ,B)

    def row_lse(l):  # stable log-sum-exp along lanes, f32
        m = jnp.max(l, axis=-1, keepdims=True)
        return m + jnp.log(jnp.sum(jnp.exp(l - m), axis=-1, keepdims=True))

    loss_ref[...] = (row_lse(logits_img) - diag) + (row_lse(logits_txt) - diag)


def _pick_block_rows(batch):
    for tq in (512, 256, 128, 64, 32, 16, 8):
        if batch % tq == 0:
            return tq
    return batch  # full-extent block is always BlockSpec-legal


def clip_loss(image_features, text_features, logit_scale, block_rows=None):
    B, D = image_features.shape
    assert text_features.shape == (B, D)
    tq = _pick_block_rows(B) if block_rows is None else block_rows
    assert B % tq == 0 and (tq % 8 == 0 or tq == B), (B, tq)
    n_tiles = B // tq

    scale_arr = jnp.asarray(logit_scale, jnp.float32).reshape(1, 1)

    # VMEM budget: both resident feature matrices + two (TQ, B) f32 logits
    # tiles; 2x headroom, clamped to stay within v7x's 64 MiB physical VMEM.
    bpe = jnp.dtype(image_features.dtype).itemsize
    est = 2 * B * D * bpe + 2 * tq * B * 4 + 8 * tq * 4
    vmem_limit = int(min(max(2 * est, 16 * 1024 * 1024), 64 * 1024 * 1024))

    per_row = pl.pallas_call(
        clip_loss_kernel,
        grid=(n_tiles,),
        out_shape=jax.ShapeDtypeStruct((B, 1), jnp.float32),
        in_specs=[
            pl.BlockSpec(memory_space=pltpu.SMEM),       # logit_scale (1,1)
            pl.BlockSpec((B, D), lambda i: (0, 0)),      # image_features (resident)
            pl.BlockSpec((B, D), lambda i: (0, 0)),      # text_features  (resident)
        ],
        out_specs=pl.BlockSpec((tq, 1), lambda i: (i, 0)),
        compiler_params=pltpu.CompilerParams(
            dimension_semantics=("parallel",),
            vmem_limit_bytes=vmem_limit,
        ),
    )(scale_arr, image_features, text_features)

    # 0.5 * (mean CE_img + mean CE_txt) == sum(per_row) / (2B). The tiny final
    # reduce is left to XLA so the row-tile axis stays fully "parallel".
    return jnp.sum(per_row) / (2.0 * B)


def clip_loss_ref(image_features, text_features, logit_scale):
    # pure-JAX reference of the PyTorch forward
    logits_img = logit_scale * image_features @ text_features.T
    logits_txt = logit_scale * text_features @ image_features.T
    labels = jnp.arange(image_features.shape[0])

    def ce(logits):
        lse = jax.nn.logsumexp(logits, axis=-1)
        correct = logits[jnp.arange(logits.shape[0]), labels]
        return jnp.mean(lse - correct)

    return 0.5 * (ce(logits_img) + ce(logits_txt))


if __name__ == "__main__":
    B, D = 32, 64
    key = jax.random.PRNGKey(0)
    k1, k2 = jax.random.split(key)
    # CLIP-style L2-normalized features (deterministic, no checkpoint load)
    img = jax.random.normal(k1, (B, D), jnp.float32)
    txt = jax.random.normal(k2, (B, D), jnp.float32)
    img = img / jnp.linalg.norm(img, axis=-1, keepdims=True)
    txt = txt / jnp.linalg.norm(txt, axis=-1, keepdims=True)
    logit_scale = jnp.float32(2.6593)  # ~ exp(log(1/0.07)) flavor constant

    # block_rows=8 -> grid=(4,) so the tiled/parallel path is exercised.
    loss = jax.block_until_ready(clip_loss(img, txt, logit_scale, block_rows=8))
    ref = jax.block_until_ready(clip_loss_ref(img, txt, logit_scale))
    assert jnp.allclose(loss, ref, atol=1e-4, rtol=1e-4), (loss, ref)
    print("KERNEL_OK")
</pallas_src>

<mosaic_0001>
module attributes {stable_mosaic.version = 11 : i64} {
  func.func @clip_loss_kernel(%arg0: i32, %arg1: memref<1x1xf32, #tpu.memory_space<smem>>, %arg2: memref<32x64xf32, #tpu.memory_space<vmem>>, %arg3: memref<32x64xf32, #tpu.memory_space<vmem>>, %arg4: memref<8x1xf32, #tpu.memory_space<vmem>>) attributes {dimension_semantics = [#tpu.dimension_semantics<parallel>], iteration_bounds = array<i64: 4>, scalar_prefetch = 0 : i64, scratch_operands = 0 : i64, tpu.core_type = #tpu.core_type<tc>, window_params = [{transform_indices = @transform_0, window_bounds = array<i64: 1, 1>}, {pipeline_mode = #tpu.pipeline_mode<synchronous>, transform_indices = @transform_1, window_bounds = array<i64: 32, 64>}, {pipeline_mode = #tpu.pipeline_mode<synchronous>, transform_indices = @transform_2, window_bounds = array<i64: 32, 64>}, {transform_indices = @transform_3, window_bounds = array<i64: 8, 1>}]} {
    %c8_i32 = arith.constant 8 : i32
    %0 = arith.muli %arg0, %c8_i32 : i32
    %1 = tpu.assume_multiple %0, 8 : i32
    %c0 = arith.constant 0 : index
    %c0_0 = arith.constant 0 : index
    %2 = memref.load %arg1[%c0, %c0_0] : memref<1x1xf32, #tpu.memory_space<smem>>
    %3 = arith.index_cast %1 : i32 to index
    %c0_1 = arith.constant 0 : index
    %4 = vector.load %arg2[%3, %c0_1] : memref<32x64xf32, #tpu.memory_space<vmem>>, vector<8x64xf32>
    %5 = arith.index_cast %1 : i32 to index
    %c0_2 = arith.constant 0 : index
    %6 = vector.load %arg3[%5, %c0_2] : memref<32x64xf32, #tpu.memory_space<vmem>>, vector<8x64xf32>
    %7 = vector.broadcast %2 : f32 to vector<8x64xf32>
    %8 = arith.mulf %4, %7 : vector<8x64xf32>
    %9 = vector.broadcast %2 : f32 to vector<8x64xf32>
    %10 = arith.mulf %6, %9 : vector<8x64xf32>
    %11 = arith.mulf %4, %6 : vector<8x64xf32>
    %cst = arith.constant dense<0.000000e+00> : vector<8xf32>
    %12 = vector.multi_reduction <add>, %11, %cst [1] : vector<8x64xf32> to vector<8xf32>
    %13 = vector.shape_cast %12 : vector<8xf32> to vector<8x1xf32>
    %14 = vector.broadcast %2 : f32 to vector<8x1xf32>
    %15 = arith.mulf %14, %13 : vector<8x1xf32>
    %c0_3 = arith.constant 0 : index
    %c0_4 = arith.constant 0 : index
    %16 = vector.load %arg3[%c0_3, %c0_4] : memref<32x64xf32, #tpu.memory_space<vmem>>, vector<32x64xf32>
    %cst_5 = arith.constant dense<0.000000e+00> : vector<8x32xf32>
    %17 = tpu.matmul %8, %16, %cst_5 {dimension_numbers = #tpu.dot_dimension_numbers<[1], [1], [0], [0], [0, 0, 1, 0], [], []>} : vector<8x64xf32>, vector<32x64xf32>, vector<8x32xf32> -> vector<8x32xf32>
    %c0_6 = arith.constant 0 : index
    %c0_7 = arith.constant 0 : index
    %18 = vector.load %arg2[%c0_6, %c0_7] : memref<32x64xf32, #tpu.memory_space<vmem>>, vector<32x64xf32>
    %cst_8 = arith.constant dense<0.000000e+00> : vector<8x32xf32>
    %19 = tpu.matmul %10, %18, %cst_8 {dimension_numbers = #tpu.dot_dimension_numbers<[1], [1], [0], [0], [0, 0, 1, 0], [], []>} : vector<8x64xf32>, vector<32x64xf32>, vector<8x32xf32> -> vector<8x32xf32>
    %cst_9 = arith.constant dense<0xFF800000> : vector<8xf32>
    %20 = vector.multi_reduction <maximumf>, %17, %cst_9 [1] : vector<8x32xf32> to vector<8xf32>
    %21 = vector.shape_cast %20 : vector<8xf32> to vector<8x1xf32>
    %22 = vector.broadcast %21 : vector<8x1xf32> to vector<8x32xf32>
    %23 = arith.subf %17, %22 : vector<8x32xf32>
    %24 = math.exp %23 : vector<8x32xf32>
    %cst_10 = arith.constant dense<0.000000e+00> : vector<8xf32>
    %25 = vector.multi_reduction <add>, %24, %cst_10 [1] : vector<8x32xf32> to vector<8xf32>
    %26 = vector.shape_cast %25 : vector<8xf32> to vector<8x1xf32>
    %27 = math.log %26 : vector<8x1xf32>
    %28 = arith.addf %21, %27 : vector<8x1xf32>
    %29 = arith.subf %28, %15 : vector<8x1xf32>
    %cst_11 = arith.constant dense<0xFF800000> : vector<8xf32>
    %30 = vector.multi_reduction <maximumf>, %19, %cst_11 [1] : vector<8x32xf32> to vector<8xf32>
    %31 = vector.shape_cast %30 : vector<8xf32> to vector<8x1xf32>
    %32 = vector.broadcast %31 : vector<8x1xf32> to vector<8x32xf32>
    %33 = arith.subf %19, %32 : vector<8x32xf32>
    %34 = math.exp %33 : vector<8x32xf32>
    %cst_12 = arith.constant dense<0.000000e+00> : vector<8xf32>
    %35 = vector.multi_reduction <add>, %34, %cst_12 [1] : vector<8x32xf32> to vector<8xf32>
    %36 = vector.shape_cast %35 : vector<8xf32> to vector<8x1xf32>
    %37 = math.log %36 : vector<8x1xf32>
    %38 = arith.addf %31, %37 : vector<8x1xf32>
    %39 = arith.subf %38, %15 : vector<8x1xf32>
    %40 = arith.addf %29, %39 : vector<8x1xf32>
    %c0_13 = arith.constant 0 : index
    %c0_14 = arith.constant 0 : index
    %41 = vector.load %arg4[%c0_13, %c0_14] : memref<8x1xf32, #tpu.memory_space<vmem>>, vector<8x1xf32>
    tpu.vector_store %arg4[%c0_13, %c0_14], %40 {strides = array<i32>} : memref<8x1xf32, #tpu.memory_space<vmem>>, vector<8x1xf32>,
    return
  }
  func.func @transform_0(%arg0: i32) -> (i32, i32) {
    %c0_i32 = arith.constant 0 : i32
    %c0_i32_0 = arith.constant 0 : i32
    %c0_i32_1 = arith.constant 0 : i32
    return %c0_i32, %c0_i32_0 : i32, i32
  }
  func.func @transform_1(%arg0: i32) -> (i32, i32) {
    %c0_i32 = arith.constant 0 : i32
    %c0_i32_0 = arith.constant 0 : i32
    %c0_i32_1 = arith.constant 0 : i32
    return %c0_i32, %c0_i32_0 : i32, i32
  }
  func.func @transform_2(%arg0: i32) -> (i32, i32) {
    %c0_i32 = arith.constant 0 : i32
    %c0_i32_0 = arith.constant 0 : i32
    %c0_i32_1 = arith.constant 0 : i32
    return %c0_i32, %c0_i32_0 : i32, i32
  }
  func.func @transform_3(%arg0: i32) -> (i32, i32) {
    %c0_i32 = arith.constant 0 : i32
    %c0_i32_0 = arith.constant 0 : i32
    return %arg0, %c0_i32 : i32, i32
  }
}

</mosaic_0001>

<bundles_post_ra>
// kernel: tpu_custom_call.1
= control target key start
LH: loop header
LB: loop body
LE: loop exit
PB: predicated region body
PF: predicated region fallthrough
CT: control target
= control target key end

     0   :  { %s796_s0 = inlined_call_operand.<no memory space> [shape: f32[1,1], index: 0, kind: input, shape index: {}]   ;;  %s797_s1 = inlined_call_operand.hbm [shape: f32[32,64], index: 1, kind: input, shape index: {}]   ;;  %s798_s2 = inlined_call_operand.hbm [shape: f32[32,64], index: 2, kind: input, shape index: {}]   ;;  %s799_s3 = inlined_call_operand.vmem [shape: f32[32,1], index: 3, kind: output, shape index: {}]  }
   0x1   :  { %8 = sst [smem:[#allocation2]] %s796_s0 }
   0x2   :  { %9 = vsyncpa [#allocation4], 0 }
   0x3   :  { %10 = vsyncpa [#allocation6], 0  ;;  %s684_s14 = smov 0  }
   0x4 LB: > { %s690_s15 = sadd.s32 4294967295, %s652_s14   ;;  %p472_p0 = scmp.ge.s32.totalorder %s652_s14, 1  ;;  %s652_s14 = sphi %s684_s14, %s16_s14  }
   0x5   : > { %p110_p1 = scmp.lt.s32.totalorder %s652_s14, 5  ;;  %s654_s16 = smov [#allocation3]  }
   0x6   : > { %s125_s0 = sshll.u32 %s654_s16, 4  ;;  %p800_p3 = scmp.eq.s32.totalorder %s690_s15, 0  ;;  %s126_s0 = int_to_ptr.vmem [resolvable:$true] %s125_s0 }
   0x7   : > { %p694_p2 = pnand %p472_p0, %p110_p1  ;;  %s655_s18 = smov [#allocation5]  }
   0x8   : > { %s138_s19 = sshll.u32 %s655_s18, 4  ;;  %s582_s23 = scalar_lea.hbm %s797_s1, 512  ;;  %s707_s19 = int_to_ptr.vmem [resolvable:$true] %s138_s19 }
   0x9   : > { %s802_s17 = scalar_select %p694_p2, 1, 0 }
   0xa   : > { %p548_p4 = pneg %p694_p2  ;;  %p583_p6 = scmp.ne.s32.totalorder %s797_s1, %s582_s23 }
   0xb   : > { %p589_p10 = scmp.lt.u32.totalorder %s582_s23, %s797_s1 }
   0xc   : > { %p703_p5 = pnand %p800_p3, %p548_p4 }
   0xe   : > { %p584_p7 = pneg %p703_p5 }
  0x10   : > { %p585_p8 = pnand %p584_p7, %p583_p6 }
  0x12   : > { %p586_p9 = pneg %p585_p8 }
  0x14   : > { %p591_p11 = pnand %p589_p10, %p586_p9 }
  0x16   : > { %594 = shalt.err (!%p591_p11)
}
  0x17   : > { %s595_s28 = scalar_lea.vmem %s126_s0, 512  ;;  %p603_p1 = scmp.lt.s32.totalorder %s126_s0, %s126_s0 }
  0x18   : > { %p596_p12 = scmp.ne.s32.totalorder %s126_s0, %s595_s28  ;;  %p604_p4 = scmp.lt.s32.totalorder %s595_s28, %s595_s28 }
  0x1a   : > { %p598_p13 = pnand %p596_p12, %p584_p7  ;;  %p605_p3 = por %p604_p4, %p603_p1 }
  0x1c   : > { %p599_p0 = pneg %p598_p13 }
  0x1e   : > { %p606_p2 = pnand %p605_p3, %p599_p0 }
  0x20   : > { %609 = shalt.err (!%p606_p2)
}
  0x21   : > { %s656_s29 = smov 128   ;;  %s657_s30 = smov 8  }
  0x22   : > { %551 = dma.hbm_to_vmem [thread:$0]  (!%p703_p5), %s797_s1, 512, %s126_s0, [#allocation4], %s656_s29, %s656_s29, %s657_s30  }
  0x23   : > { %s610_s8 = scalar_lea.hbm %s798_s2, 512 }
  0x24   : > { %p611_p6 = scmp.ne.s32.totalorder %s798_s2, %s610_s8  ;;  %p617_p8 = scmp.lt.u32.totalorder %s610_s8, %s798_s2 }
  0x26   : > { %p613_p2 = pnand %p611_p6, %p584_p7 }
  0x28   : > { %p614_p3 = pneg %p613_p2 }
  0x2a   : > { %p619_p9 = pnand %p617_p8, %p614_p3 }
  0x2c   : > { %622 = shalt.err (!%p619_p9)
}
  0x2d   : > { %s623_s13 = scalar_lea.vmem %s707_s19, 512  ;;  %p631_p13 = scmp.lt.s32.totalorder %s707_s19, %s707_s19 }
  0x2e   : > { %p624_p10 = scmp.ne.s32.totalorder %s707_s19, %s623_s13  ;;  %p632_p0 = scmp.lt.s32.totalorder %s623_s13, %s623_s13 }
  0x30   : > { %p626_p11 = pnand %p624_p10, %p584_p7  ;;  %p633_p1 = por %p632_p0, %p631_p13 }
  0x32   : > { %p627_p12 = pneg %p626_p11 }
  0x34   : > { %p634_p4 = pnand %p633_p1, %p627_p12 }
  0x36   : > { %637 = shalt.err (!%p634_p4)
}
  0x37   : > { %554 = dma.hbm_to_vmem [thread:$0]  (!%p703_p5), %s798_s2, 512, %s707_s19, [#allocation6], %s656_s29, %s656_s29, %s657_s30  }
  0x38   : > { %p804_p6 = scmp.ne.s32.totalorder %s802_s17, 0 }
  0x39   : > { %p805_p2 = scmp.eq.s32.totalorder (!%p804_p6), %s690_s15, 0 }
  0x3a   : > { %154 = sbr.rel (%p804_p6) target bundleno = 624 (0x270), region = 32 }
  0x41   : > { %643 = dma.done.wait (%p805_p2), [#allocation4], 512   ;;  %p806_p7 = pmov %p805_p2 }
  0x42   : > { %p807_p3 = pmov %p805_p2 }
  0x43   : > { %645 = vsyncadd (%p806_p7), [#allocation4], 4294966784 }
  0x44   : > { %647 = dma.done.wait (%p807_p3), [#allocation6], 512   ;;  %p808_p8 = pmov %p805_p2 }
  0x45   : > { %v658_v0 = vmov 0.0|0.0   ;;  %vm659_vm0 = vmmov 0   ;;  %v660_v1 = vmov 0.0   ;;  %vm190_vm1 = vcmask 523264   ;;  %v195_v3 = vld [vmem:[#allocation5] sm:$0xff]  ;;  %v196_v4 = vld [vmem:[#allocation5 + $0x8] sm:$0xff] }
  0x46   : > { %649 = vsyncadd (%p808_p8), [#allocation6], 4294966784  ;;  %524 = vmatprep.subr.bf16.mxu0 %v658_v0  ;;  %532 = vmatprep.subr.bf16.mxu1 %v658_v0  ;;  %v284_v5 = vld [vmem:[#allocation3] sm:$0xff]  ;;  %v525_v6 = vpack.c.bf16 %v196_v4, %v195_v3  ;;  %v285_v7 = vld [vmem:[#allocation3 + $0x8] sm:$0xff]  ;;  %s181_s17 = sld [smem:[#allocation2]]  ;;  %s479_s18 = sshll.u32 %s690_s15, 3 }
  0x47   : > { %510 = vmatprep.mubr.msk.f32.mxu0 %vm659_vm0, %v660_v1  ;;  %521 = vmatprep.mubr.msk.f32.mxu1 %vm659_vm0, %v660_v1  ;;  %vm768_vm2 = vmpackc.low %vm190_vm1, %vm190_vm1  ;;  %v533_v8 = vpack.c.bf16 %v285_v7, %v284_v5  ;;  %v197_v9 = vld [vmem:[#allocation5 + $0x10] sm:$0xff]  ;;  %v198_v10 = vld [vmem:[#allocation5 + $0x18] sm:$0xff]  ;;  %s182_s19 = scalar_lea.vmem [#allocation3], %s479_s18  ;;  %s184_s20 = scalar_lea.vmem [#allocation5], %s479_s18  ;;  %vm373_vm3 = vcmask 261120   ;;  %vm401_vm4 = vcmask 7168  }
  0x48   : > { %527 = vmatpush3.bf16.xpose.msk.msra.mxu0 %vm768_vm2, %v525_v6  ;;  %v286_v11 = vld [vmem:[#allocation3 + $0x10] sm:$0xff]  ;;  %v287_v12 = vld [vmem:[#allocation3 + $0x18] sm:$0xff]  ;;  %v529_v13 = vpack.c.bf16 %v198_v10, %v197_v9  ;;  %v183_v15 = vld [vmem:[%s182_s19] sm:$0xff]  ;;  %p176_p5 = scmp.lt.s32.totalorder %s690_s15, 3 }
  0x49   : > { %535 = vmatpush3.bf16.xpose.msk.msra.mxu1 %vm768_vm2, %v533_v8  ;;  %528 = vmatprep.subr.bf16.mxu0 %v658_v0  ;;  %v537_v14 = vpack.c.bf16 %v287_v12, %v286_v11  ;;  %v185_v17 = vld [vmem:[%s184_s20] sm:$0xff] }
  0x4a   : > { %536 = vmatprep.subr.bf16.mxu1 %v658_v0  ;;  %v189_v26 = vmul.f32 %v185_v17, %v183_v15  ;;  %s812_s15 = smov (!%p176_p5, %s690_s15), 3 }
  0x4b   : > { %s478_s21 = sshll.u32 %s812_s15, 3 }
  0x4c   : > { %v186_v16 = vstv %s181_s17  ;;  %v191_v27 = vsel %vm190_vm1, %v189_v26, 0.0  ;;  %s179_s24 = scalar_lea.vmem %s799_s3, %s478_s21 }
  0x4d   : > { %v187_v18 = vmul.f32 %v186_v16, %v183_v15  ;;  %v188_v19 = vmul.f32 %v186_v16, %v185_v17 }
  0x50   : > { %531 = vmatpush3.bf16.xpose.msk.msra.mxu0 %vm768_vm2, %v529_v13 }
  0x51   : > { %539 = vmatpush3.bf16.xpose.msk.msra.mxu1 %vm768_vm2, %v537_v14 }
  0x57   : > { %511 = vmatmul.mubr.msk.f32.vlgmr.msra.gmra.mrb[0].mxu0 %vm190_vm1, %v187_v18 }
  0x58   : > { %522 = vmatmul.mubr.msk.f32.vlgmr.msra.gmra.mrb[0].mxu1 %vm190_vm1, %v188_v19 }
 0x12a   : > { %v280_v20 = vpop.f32.mrb[0].mxu0 }
 0x12b   : > { %v512_v21 = vpop.f32.mrb[1].mxu0  ;;  %v374_v22 = vsel %vm373_vm3, %v280_v20, -inf  ;;  %v369_v23 = vpop.f32.mrb[0].mxu1 }
 0x12c   : > { %375 = vmax.xlane.f32.xlu0 %v374_v22  ;;  %v523_v24 = vpop.f32.mrb[1].mxu1  ;;  %v387_v25 = vsel %vm373_vm3, %v369_v23, -inf }
 0x130   : > { %388 = vmax.xlane.f32.xlu0 %v387_v25 }
 0x134   : > { %192 = vadd.xlane.f32.xlu0 %v191_v27 }
 0x1b9   : > { %v376_v28 = vpop.xlane.xlu0 %375 }
 0x1ba   : > { %v377_v29 = vsub.f32 %v280_v20, %v376_v28 }
 0x1bc   : > { %v378_v30 = vmul.f32 1.442695, %v377_v29 }
 0x1bd   : > { %v389_v31 = vpop.xlane.xlu0 %388 }
 0x1be   : > { %574 = vpow2.f32 %v378_v30  ;;  %v390_v32 = vsub.f32 %v369_v23, %v389_v31 }
 0x1c0   : > { %v391_v33 = vmul.f32 1.442695, %v390_v32 }
 0x1c1   : > { %v193_v42 = vpop.xlane.xlu0 %192 }
 0x1c2   : > { %576 = vpow2.f32 %v391_v33  ;;  %v194_v46 = vmul.f32 %v193_v42, %v186_v16 }
 0x1c8   : > { %v575_v34 = vpop.eup %574 }
 0x1c9   : > { %v380_v35 = vsel %vm373_vm3, %v575_v34, 0.0 }
 0x1ca   : > { %381 = vadd.xlane.f32.xlu1 %v380_v35 }
 0x1cc   : > { %v577_v36 = vpop.eup %576 }
 0x1cd   : > { %v393_v37 = vsel %vm373_vm3, %v577_v36, 0.0 }
 0x1ce   : > { %394 = vadd.xlane.f32.xlu1 %v393_v37 }
 0x257   : > { %v382_v38 = vpop.xlane.xlu1 %381 }
 0x258   : > { %578 = vlog2.f32 %v382_v38 }
 0x25b   : > { %v395_v39 = vpop.xlane.xlu1 %394 }
 0x25c   : > { %580 = vlog2.f32 %v395_v39 }
 0x262   : > { %v579_v40 = vpop.eup %578 }
 0x263   : > { %v384_v41 = vmul.f32 0.6931472, %v579_v40 }
 0x265   : > { %v385_v45 = vadd.f32 %v384_v41, %v376_v28 }
 0x266   : > { %v581_v43 = vpop.eup %580 }
 0x267   : > { %v397_v44 = vmul.f32 0.6931472, %v581_v43  ;;  %v386_v48 = vsub.f32 %v385_v45, %v194_v46 }
 0x269   : > { %v398_v47 = vadd.f32 %v397_v44, %v389_v31 }
 0x26b   : > { %v399_v49 = vsub.f32 %v398_v47, %v194_v46 }
 0x26d   : > { %v400_v50 = vadd.f32 %v399_v49, %v386_v48 }
 0x26f   : > { %402 = vst.msk [vmem:[%s179_s24] sm:$0xff] %vm401_vm4, %v400_v50 }
 0x270 PF: > { %s16_s14 = sadd.s32 1, %s652_s14  }
 0x271   : > { %p13_p9 = scmp.ge.s32.totalorder %s16_s14, 6  }
 0x273   :  { %15 = sbr.rel (!%p13_p9) target bundleno = 4 (0x4), region = 70 }
 0x27a   :  { %422 = vsyncpa [#allocation4], 1 }
 0x27b   :  { %424 = vsyncpa [#allocation4 + $0x1], 1 }
 0x27c   :  { %425 = vsyncpa [#allocation6], 1 }

</bundles_post_ra>
